<compile_context>
chip_gen: v6e
topology: v6e:2x2x1
jax: 0.10.0
libtpu: 0.0.40
codegen_flags: <defaults>
</compile_context>

<pallas_src>
import functools
import math

import jax
import jax.numpy as jnp
from jax.experimental import pallas as pl
from jax.experimental.pallas import tpu as pltpu

_LANE = 128
_SUBLANE = 8


def _ocsoftmax_kernel(w_ref, slab_ref, out_ref, acc_ref, *, r_real, r_fake,
                      alpha):
    """One grid step over a (D + 2, block_rows, 128) batch slab.

    slab planes: [x_0 .. x_{D-1}, labels, weight]; weight = 1/B (0 for pad).
    w_ref: (D,) f32 pre-normalized center in SMEM (scalar reads).
    acc_ref: (block_rows, 128) f32 running sum of weight * softplus(alpha*m).
    """
    g = pl.program_id(0)

    @pl.when(g == 0)
    def _():
        acc_ref[...] = jnp.zeros_like(acc_ref)

    n_feat = slab_ref.shape[0] - 2
    # F.normalize clamps the norm with eps=1e-12; rsqrt(max(sumsq, eps^2))
    # == 1 / max(norm, eps).
    eps_sq = jnp.float32(1e-24)

    # Unrolled D reduction on dense (block_rows, 128) vregs: pure VPU FMAs.
    # Center weights are SMEM scalars -> scalar slots, no vector broadcast.
    x0 = slab_ref[0, :, :]
    dot = x0 * w_ref[0]
    sumsq = x0 * x0
    for d in range(1, n_feat):
        xd = slab_ref[d, :, :]
        dot = dot + xd * w_ref[d]
        sumsq = sumsq + xd * xd

    lab = slab_ref[n_feat, :, :]          # labels in {0, 1} (f32)
    wgt = slab_ref[n_feat + 1, :, :]      # 1/B for valid samples, 0 for pad

    # normalize(x) . w  (w is already unit-norm): one EUP rsqrt per element.
    score = dot * jax.lax.rsqrt(jnp.maximum(sumsq, eps_sq))

    # Branch-free margin with alpha folded in (labels are binary):
    #   lab == 1 -> alpha * (r_real - score)
    #   lab == 0 -> alpha * (score - r_fake)
    c1 = lab * jnp.float32(-2.0 * alpha) + jnp.float32(alpha)
    c0 = lab * jnp.float32(alpha * (r_real + r_fake)) + jnp.float32(-alpha * r_fake)
    z = score * c1 + c0

    # softplus(z) = logaddexp(z, 0); weight already carries the 1/B divisor.
    acc_ref[...] += wgt * jnp.logaddexp(z, jnp.float32(0.0))

    # Cross-lane/sublane reduction only once, on the last step (keeps XLU
    # work out of the inner loop; single masked (1,1) store at the end).
    @pl.when(g == pl.num_programs(0) - 1)
    def _():
        part = jnp.sum(acc_ref[...], axis=1, keepdims=True)   # (block_rows, 1)
        out_ref[...] = jnp.sum(part, axis=0, keepdims=True)   # (1, 1)


@functools.partial(
    jax.jit, static_argnames=("r_real", "r_fake", "alpha", "max_block_rows"))
def ocsoftmax_loss(x, center, labels, *, r_real=0.9, r_fake=0.5, alpha=20.0,
                   max_block_rows=1024):
    """x: (B, D) float, center: (1, D) float, labels: (B,) int -> f32 loss.

    max_block_rows controls bytes streamed per grid step
    (= (D+2) * 512 * max_block_rows bytes): ~512 rows (1-2 MB) for v5e,
    ~1024-2048 for v6e, ~2048-4096 for v7x (bump vmem_limit_bytes there).
    """
    B, D = x.shape
    n_planes = D + 2

    # ---- batch layout: sublane+lane dense slab of (D+2) planes ------------
    rows_needed = -(-B // _LANE)                       # ceil(B / 128)
    rows_total = -(-rows_needed // _SUBLANE) * _SUBLANE
    block_rows = min(max_block_rows, rows_total)
    num_blocks = -(-rows_total // block_rows)
    rows_total = num_blocks * block_rows
    b_pad = rows_total * _LANE

    xf = x.astype(jnp.float32)
    labf = labels.reshape(-1).astype(jnp.float32)
    wgtf = jnp.full((B,), 1.0 / B, jnp.float32)        # mean divisor, 0 on pad

    # TODO(synk): for huge memory-bound batches, stream labels as int8 and x
    # as bf16 (upconvert in-kernel) to cut HBM bytes/sample; kept f32 here so
    # everything packs into one slab / one DMA.
    x_planes = jnp.pad(xf, ((0, b_pad - B), (0, 0))).T          # (D, b_pad)
    lab_plane = jnp.pad(labf, (0, b_pad - B)).reshape(1, b_pad)
    wgt_plane = jnp.pad(wgtf, (0, b_pad - B)).reshape(1, b_pad)
    slab = jnp.concatenate([x_planes, lab_plane, wgt_plane], axis=0)
    slab = slab.reshape(n_planes, rows_total, _LANE)

    # ---- pre-normalize the center once (D=2; trivially fused under jit) ---
    cf = center.astype(jnp.float32).reshape(1, D)
    cnorm = jnp.sqrt(jnp.sum(cf * cf, axis=1, keepdims=True))
    w = (cf / jnp.maximum(cnorm, 1e-12)).reshape(D)

    kernel = functools.partial(
        _ocsoftmax_kernel,
        r_real=float(r_real), r_fake=float(r_fake), alpha=float(alpha))

    # Only raise the scoped VMEM limit when the chosen block actually needs
    # it (2 double-buffered slab blocks + the accumulator + headroom).
    block_bytes = n_planes * block_rows * _LANE * 4
    vmem_need = 2 * block_bytes + block_rows * _LANE * 4 + (1 << 20)
    vmem_limit = vmem_need if vmem_need > (16 << 20) else None

    grid_spec = pltpu.PrefetchScalarGridSpec(
        num_scalar_prefetch=0,
        grid=(num_blocks,),
        in_specs=[
            # Pre-normalized center: D scalars in SMEM.
            pl.BlockSpec(memory_space=pltpu.MemorySpace.SMEM),
            # Packed slab: one lane-dense block per grid step.
            pl.BlockSpec((n_planes, block_rows, _LANE), lambda g: (0, g, 0)),
        ],
        out_specs=pl.BlockSpec((1, 1), lambda g: (0, 0)),
        scratch_shapes=[pltpu.VMEM((block_rows, _LANE), jnp.float32)],
    )

    # The batch grid axis is a reduction feeding a resident scalar output, so
    # it stays "arbitrary".
    # TODO(synk): on v7x, exploit the two TensorCores with a leading core axis
    # of size 2 and per-core (2, 1) partial outputs summed in the wrapper --
    # NOT by marking this reduction axis "parallel".
    out = pl.pallas_call(
        kernel,
        out_shape=jax.ShapeDtypeStruct((1, 1), jnp.float32),
        grid_spec=grid_spec,
        compiler_params=pltpu.CompilerParams(
            dimension_semantics=("arbitrary",),
            vmem_limit_bytes=vmem_limit),
    )(w, slab)
    return out[0, 0]


def init_center(key, feat_dim=2, a=0.25):
    # Mirrors nn.init.kaiming_uniform_(center, a=0.25) on shape (1, feat_dim).
    fan_in = feat_dim
    gain = math.sqrt(2.0 / (1.0 + a * a))
    bound = gain * math.sqrt(3.0 / fan_in)
    return jax.random.uniform(key, (1, feat_dim), jnp.float32, -bound, bound)


def _reference_loss(x, center, labels, r_real=0.9, r_fake=0.5, alpha=20.0):
    # Pure-JAX mirror of the PyTorch module's forward.
    w = center / jnp.maximum(jnp.linalg.norm(center, axis=1, keepdims=True), 1e-12)
    xn = x / jnp.maximum(jnp.linalg.norm(x, axis=1, keepdims=True), 1e-12)
    scores = xn @ w.T
    lab = labels.reshape(-1, 1)
    scores = jnp.where(lab == 1, r_real - scores, scores)
    scores = jnp.where(lab == 0, scores - r_fake, scores)
    return jnp.mean(jax.nn.softplus(alpha * scores))


if __name__ == "__main__":
    key = jax.random.PRNGKey(0)
    k_x, k_c, k_l = jax.random.split(key, 3)

    B, D = 8, 2  # batch_size, feat_dim (module default feat_dim=2)
    x = jax.random.normal(k_x, (B, D), jnp.float32)
    center = init_center(k_c, feat_dim=D)
    labels = jax.random.bernoulli(k_l, 0.5, (B,)).astype(jnp.int32)

    loss = ocsoftmax_loss(x, center, labels)
    jax.block_until_ready(loss)
    ref = _reference_loss(x, center, labels)
    assert jnp.allclose(loss, ref, rtol=1e-5, atol=1e-5), (loss, ref)

    # Also exercise the tiled multi-step (grid > 1) reduction path at a small
    # size by shrinking the block.
    B2 = 3000
    k_x2, k_l2 = jax.random.split(k_x)
    x2 = jax.random.normal(k_x2, (B2, D), jnp.float32)
    labels2 = jax.random.bernoulli(k_l2, 0.5, (B2,)).astype(jnp.int32)
    loss2 = ocsoftmax_loss(x2, center, labels2, max_block_rows=8)
    jax.block_until_ready(loss2)
    ref2 = _reference_loss(x2, center, labels2)
    assert jnp.allclose(loss2, ref2, rtol=1e-5, atol=1e-5), (loss2, ref2)

    print("KERNEL_OK")
</pallas_src>

<mosaic_0001>
module attributes {stable_mosaic.version = 11 : i64} {
  func.func @_ocsoftmax_kernel(%arg0: i32, %arg1: memref<2xf32, #tpu.memory_space<smem>>, %arg2: memref<4x8x128xf32, #tpu.memory_space<vmem>>, %arg3: memref<1x1xf32, #tpu.memory_space<vmem>>, %arg4: memref<8x128xf32, #tpu.memory_space<vmem>>) attributes {dimension_semantics = [#tpu.dimension_semantics<arbitrary>], iteration_bounds = array<i64: 1>, scalar_prefetch = 0 : i64, scratch_operands = 1 : i64, tpu.core_type = #tpu.core_type<tc>, window_params = [{transform_indices = @transform_0, window_bounds = array<i64: 2>}, {transform_indices = @transform_1, window_bounds = array<i64: 4, 8, 128>}, {pipeline_mode = #tpu.pipeline_mode<synchronous>, transform_indices = @transform_2, window_bounds = array<i64: 1, 1>}]} {
    %c0_i32 = arith.constant 0 : i32
    %0 = arith.cmpi eq, %arg0, %c0_i32 : i32
    %1 = arith.extui %0 : i1 to i32
    %c0_i32_0 = arith.constant 0 : i32
    %2 = arith.cmpi ne, %1, %c0_i32_0 : i32
    scf.if %2 {
      %cst_23 = arith.constant 0.000000e+00 : f32
      %56 = vector.broadcast %cst_23 : f32 to vector<8x128xf32>
      %c0_24 = arith.constant 0 : index
      %c0_25 = arith.constant 0 : index
      %57 = vector.load %arg4[%c0_24, %c0_25] : memref<8x128xf32, #tpu.memory_space<vmem>>, vector<8x128xf32>
      tpu.vector_store %arg4[%c0_24, %c0_25], %56 {strides = array<i32>} : memref<8x128xf32, #tpu.memory_space<vmem>>, vector<8x128xf32>,
    } else {
    }
    %c0 = arith.constant 0 : index
    %c0_1 = arith.constant 0 : index
    %c0_2 = arith.constant 0 : index
    %3 = vector.load %arg2[%c0, %c0_1, %c0_2] : memref<4x8x128xf32, #tpu.memory_space<vmem>>, vector<1x8x128xf32>
    %4 = vector.shape_cast %3 : vector<1x8x128xf32> to vector<8x128xf32>
    %c0_3 = arith.constant 0 : index
    %5 = memref.load %arg1[%c0_3] : memref<2xf32, #tpu.memory_space<smem>>
    %6 = vector.broadcast %5 : f32 to vector<8x128xf32>
    %7 = arith.mulf %4, %6 : vector<8x128xf32>
    %8 = arith.mulf %4, %4 : vector<8x128xf32>
    %c1 = arith.constant 1 : index
    %c0_4 = arith.constant 0 : index
    %c0_5 = arith.constant 0 : index
    %9 = vector.load %arg2[%c1, %c0_4, %c0_5] : memref<4x8x128xf32, #tpu.memory_space<vmem>>, vector<1x8x128xf32>
    %10 = vector.shape_cast %9 : vector<1x8x128xf32> to vector<8x128xf32>
    %c1_6 = arith.constant 1 : index
    %11 = memref.load %arg1[%c1_6] : memref<2xf32, #tpu.memory_space<smem>>
    %12 = vector.broadcast %11 : f32 to vector<8x128xf32>
    %13 = arith.mulf %10, %12 : vector<8x128xf32>
    %14 = arith.addf %7, %13 : vector<8x128xf32>
    %15 = arith.mulf %10, %10 : vector<8x128xf32>
    %16 = arith.addf %8, %15 : vector<8x128xf32>
    %c2 = arith.constant 2 : index
    %c0_7 = arith.constant 0 : index
    %c0_8 = arith.constant 0 : index
    %17 = vector.load %arg2[%c2, %c0_7, %c0_8] : memref<4x8x128xf32, #tpu.memory_space<vmem>>, vector<1x8x128xf32>
    %18 = vector.shape_cast %17 : vector<1x8x128xf32> to vector<8x128xf32>
    %c3 = arith.constant 3 : index
    %c0_9 = arith.constant 0 : index
    %c0_10 = arith.constant 0 : index
    %19 = vector.load %arg2[%c3, %c0_9, %c0_10] : memref<4x8x128xf32, #tpu.memory_space<vmem>>, vector<1x8x128xf32>
    %20 = vector.shape_cast %19 : vector<1x8x128xf32> to vector<8x128xf32>
    %cst = arith.constant 1.000000e-24 : f32
    %21 = vector.broadcast %cst : f32 to vector<8x128xf32>
    %22 = arith.maximumf %16, %21 : vector<8x128xf32>
    %23 = math.rsqrt %22 : vector<8x128xf32>
    %24 = arith.mulf %14, %23 : vector<8x128xf32>
    %cst_11 = arith.constant -4.000000e+01 : f32
    %25 = vector.broadcast %cst_11 : f32 to vector<8x128xf32>
    %26 = arith.mulf %18, %25 : vector<8x128xf32>
    %cst_12 = arith.constant 2.000000e+01 : f32
    %27 = vector.broadcast %cst_12 : f32 to vector<8x128xf32>
    %28 = arith.addf %26, %27 : vector<8x128xf32>
    %cst_13 = arith.constant 2.800000e+01 : f32
    %29 = vector.broadcast %cst_13 : f32 to vector<8x128xf32>
    %30 = arith.mulf %18, %29 : vector<8x128xf32>
    %cst_14 = arith.constant -1.000000e+01 : f32
    %31 = vector.broadcast %cst_14 : f32 to vector<8x128xf32>
    %32 = arith.addf %30, %31 : vector<8x128xf32>
    %33 = arith.mulf %24, %28 : vector<8x128xf32>
    %34 = arith.addf %33, %32 : vector<8x128xf32>
    %c0_15 = arith.constant 0 : index
    %c0_16 = arith.constant 0 : index
    %35 = vector.load %arg4[%c0_15, %c0_16] : memref<8x128xf32, #tpu.memory_space<vmem>>, vector<8x128xf32>
    %cst_17 = arith.constant 0.000000e+00 : f32
    %36 = vector.broadcast %cst_17 : f32 to vector<8x128xf32>
    %37 = arith.maximumf %34, %36 : vector<8x128xf32>
    %38 = vector.broadcast %cst_17 : f32 to vector<8x128xf32>
    %39 = arith.subf %34, %38 : vector<8x128xf32>
    %40 = arith.cmpf one, %39, %39 : vector<8x128xf32>
    %41 = vector.broadcast %cst_17 : f32 to vector<8x128xf32>
    %42 = arith.addf %34, %41 : vector<8x128xf32>
    %43 = math.absf %39 : vector<8x128xf32>
    %cst_18 = arith.constant 0.000000e+00 : f32
    %44 = vector.broadcast %cst_18 : f32 to vector<8x128xf32>
    %45 = arith.subf %44, %43 : vector<8x128xf32>
    %46 = math.exp %45 : vector<8x128xf32>
    %47 = math.log1p %46 : vector<8x128xf32>
    %48 = arith.addf %37, %47 : vector<8x128xf32>
    %49 = arith.select %40, %42, %48 : vector<8x128xi1>, vector<8x128xf32>
    %50 = arith.mulf %20, %49 : vector<8x128xf32>
    %51 = arith.addf %35, %50 : vector<8x128xf32>
    %c0_19 = arith.constant 0 : index
    %c0_20 = arith.constant 0 : index
    %52 = vector.load %arg4[%c0_19, %c0_20] : memref<8x128xf32, #tpu.memory_space<vmem>>, vector<8x128xf32>
    tpu.vector_store %arg4[%c0_19, %c0_20], %51 {strides = array<i32>} : memref<8x128xf32, #tpu.memory_space<vmem>>, vector<8x128xf32>,
    %c0_i32_21 = arith.constant 0 : i32
    %53 = arith.cmpi eq, %arg0, %c0_i32_21 : i32
    %54 = arith.extui %53 : i1 to i32
    %c0_i32_22 = arith.constant 0 : i32
    %55 = arith.cmpi ne, %54, %c0_i32_22 : i32
    scf.if %55 {
      %c0_23 = arith.constant 0 : index
      %c0_24 = arith.constant 0 : index
      %56 = vector.load %arg4[%c0_23, %c0_24] : memref<8x128xf32, #tpu.memory_space<vmem>>, vector<8x128xf32>
      %cst_25 = arith.constant dense<0.000000e+00> : vector<8xf32>
      %57 = vector.multi_reduction <add>, %56, %cst_25 [1] : vector<8x128xf32> to vector<8xf32>
      %58 = vector.shape_cast %57 : vector<8xf32> to vector<8x1xf32>
      %cst_26 = arith.constant dense<0.000000e+00> : vector<1xf32>
      %59 = vector.multi_reduction <add>, %58, %cst_26 [0] : vector<8x1xf32> to vector<1xf32>
      %60 = vector.shape_cast %59 : vector<1xf32> to vector<1x1xf32>
      %c0_27 = arith.constant 0 : index
      %c0_28 = arith.constant 0 : index
      %61 = vector.load %arg3[%c0_27, %c0_28] : memref<1x1xf32, #tpu.memory_space<vmem>>, vector<1x1xf32>
      tpu.vector_store %arg3[%c0_27, %c0_28], %60 {strides = array<i32>} : memref<1x1xf32, #tpu.memory_space<vmem>>, vector<1x1xf32>,
    } else {
    }
    return
  }
  func.func @transform_0(%arg0: i32) -> i32 {
    %c0_i32 = arith.constant 0 : i32
    %c0_i32_0 = arith.constant 0 : i32
    return %c0_i32 : i32
  }
  func.func @transform_1(%arg0: i32) -> (i32, i32, i32) {
    %c0_i32 = arith.constant 0 : i32
    %c0_i32_0 = arith.constant 0 : i32
    %c0_i32_1 = arith.constant 0 : i32
    return %c0_i32, %arg0, %c0_i32_0 : i32, i32, i32
  }
  func.func @transform_2(%arg0: i32) -> (i32, i32) {
    %c0_i32 = arith.constant 0 : i32
    %c0_i32_0 = arith.constant 0 : i32
    %c0_i32_1 = arith.constant 0 : i32
    return %c0_i32, %c0_i32_0 : i32, i32
  }
}

</mosaic_0001>

<bundles_post_ra>
// kernel: ocsoftmax_loss.1
= control target key start
LH: loop header
LB: loop body
LE: loop exit
PB: predicated region body
PF: predicated region fallthrough
CT: control target
= control target key end

     0   :  { %7 = vsyncpa [#allocation5], 0  ;;  %s190_s0 = inlined_call_operand.vmem [shape: f32[2], index: 0, kind: input, shape index: {}]   ;;  %s191_s1 = inlined_call_operand.vmem [shape: f32[4,8,128], index: 1, kind: input, shape index: {}]   ;;  %s192_s2 = inlined_call_operand.hbm [shape: f32[1,1], index: 2, kind: output, shape index: {}]  }
   0x1   :  { %8 = vsyncpa [#allocation4], 0  ;;  %s15_s11 = sshll.u32 %s190_s0, 4  ;;  %s16_s11 = int_to_ptr.vmem [resolvable:$true] %s15_s11 }
   0x2   :  { %s119_s12 = scalar_lea.vmem %s16_s11, 16  ;;  %p124_p1 = scmp.lt.s32.totalorder %s16_s11, %s16_s11 }
   0x3   :  { %p120_p0 = scmp.ne.s32.totalorder %s16_s11, %s119_s12  ;;  %p125_p2 = scmp.lt.s32.totalorder %s119_s12, %s119_s12 }
   0x5   :  { %p126_p3 = por %p125_p2, %p124_p1 }
   0x7   :  { %p127_p4 = pnand %p126_p3, %p120_p0 }
   0x9   :  { %130 = shalt.err (!%p127_p4)
}
   0xa   :  { %s155_s13 = smov [#allocation3]  }
   0xb   :  { %18 = dma.vmem_to_smem %s16_s11, 16, %s155_s13, [#allocation5]  }
   0xc   :  { %151 = dma.done.wait [#allocation5], 16  }
   0xd   :  { %152 = vsyncadd [#allocation5], 4294967280 }
   0xe   :  { %24 = sfence }
   0xf   :  { %v30_v0 = vld [vmem:[%s191_s1] sm:$0xff]  ;;  %v107_v1 = vld [vmem:[%s191_s1 + $0x8] sm:$0xff]  ;;  %s31_s0 = sld [smem:[#allocation3]]  ;;  %v109_v8 = vld [vmem:[%s191_s1 + $0x10] sm:$0xff]  ;;  %s156_s23 = smov [#allocation6]   ;;  %vm90_vm2 = vcmask 0  }
  0x10   :  { %v34_v2 = vmul.f32 %v30_v0, %v30_v0  ;;  %v41_v3 = vmul.f32 %v107_v1, %v107_v1  ;;  %s108_s18 = sld [smem:[#allocation3 + $0x1]]  ;;  %v50_v11 = vmul.f32 -40.0, %v109_v8  ;;  %v52_v13 = vmul.f32 28.0, %v109_v8  ;;  %v110_v33 = vld [vmem:[%s191_s1 + $0x18] sm:$0xff]  ;;  %s98_s24 = sshll.u32 %s156_s23, 4  ;;  %s99_s24 = int_to_ptr.vmem [resolvable:$true] %s98_s24 }
  0x11   :  { %s131_s25 = scalar_lea.vmem %s99_s24, 16  ;;  %s135_s26 = scalar_lea.vmem %s99_s24, 32 }
  0x12   :  { %v42_v4 = vadd.f32 %v41_v3, %v34_v2  ;;  %v51_v14 = vadd.f32 20.0, %v50_v11  ;;  %v53_v17 = vadd.f32 -10.0, %v52_v13  ;;  %p132_p5 = scmp.ne.s32.totalorder %s99_s24, %s131_s25  ;;  %p136_p6 = scmp.lt.s32.totalorder %s99_s24, %s99_s24 }
  0x13   :  { %p137_p7 = scmp.lt.s32.totalorder %s135_s26, %s131_s25 }
  0x14   :  { %v47_v5 = vmax.f32 %v42_v4, 1e-24 }
  0x15   :  { %v32_v6 = vstv %s31_s0  ;;  %p138_p8 = por %p137_p7, %p136_p6 }
  0x16   :  { %113 = vrsqrt.f32 %v47_v5  ;;  %v38_v7 = vstv %s108_s18  ;;  %v33_v9 = vmul.f32 %v32_v6, %v30_v0 }
  0x17   :  { %v39_v10 = vmul.f32 %v107_v1, %v38_v7  ;;  %p139_p9 = pnand %p138_p8, %p132_p5 }
  0x19   :  { %v40_v12 = vadd.f32 %v39_v10, %v33_v9 }
  0x23   :  { %v114_v15 = vpop.eup %113 }
  0x24   :  { %v49_v16 = vmul.f32 %v114_v15, %v40_v12 }
  0x26   :  { %v54_v18 = vmul.f32 %v51_v14, %v49_v16 }
  0x28   :  { %v55_v19 = vadd.f32 %v54_v18, %v53_v17 }
  0x2a   :  { %v60_v20 = vand.u32 2147483647, %v55_v19  ;;  %v57_v30 = vmax.f32 %v55_v19, 0.0  ;;  %vm58_vm1 = vcmp.ne.f32.partialorder %v55_v19, %v55_v19 }
  0x2c   :  { %v61_v21 = vsub.f32 0.0, %v60_v20 }
  0x2e   :  { %v62_v22 = vmul.f32 1.442695, %v61_v21 }
  0x30   :  { %115 = vpow2.f32 %v62_v22 }
  0x3d   :  { %v116_v23 = vpop.eup %115 }
  0x3e   :  { %v64_v24 = vadd.f32 1.0, %v116_v23  ;;  %v67_v25 = vmul.f32 -0.5, %v116_v23  ;;  %v70_v27 = vand.u32 2147483647, %v116_v23 }
  0x40   :  { %117 = vlog2.f32 %v64_v24  ;;  %v68_v26 = vadd.f32 1.0, %v67_v25  ;;  %vm71_vm0 = vcmp.lt.f32.partialorder %v70_v27, 0.0004427343 }
  0x42   :  { %v69_v28 = vmul.f32 %v116_v23, %v68_v26 }
  0x4d   :  { %v118_v29 = vpop.eup %117 }
  0x4e   :  { %v66_v31 = vmul.f32 0.6931472, %v118_v29 }
  0x50   :  { %v72_v32 = vsel %vm71_vm0, %v69_v28, %v66_v31 }
  0x51   :  { %v73_v34 = vadd.f32 %v72_v32, %v57_v30 }
  0x53   :  { %v74_v35 = vsel %vm58_vm1, %v55_v19, %v73_v34 }
  0x54   :  { %v75_v36 = vmul.f32 %v110_v33, %v74_v35 }
  0x56   :  { %82 = vadd.xlane.f32.xlu0 %v75_v36 }
  0xdf   :  { %v83_v37 = vpop.xlane.xlu0 %82 }
  0xe0   :  { %v84_v38 = vrot.slane %v83_v37, 4 }
  0xe2   :  { %v85_v39 = vadd.f32 %v84_v38, %v83_v37 }
  0xe4   :  { %v86_v40 = vrot.slane %v85_v39, 2 }
  0xe6   :  { %v87_v41 = vadd.f32 %v86_v40, %v85_v39 }
  0xe8   :  { %v88_v42 = vrot.slane %v87_v41, 1 }
  0xea   :  { %v89_v43 = vadd.f32 %v88_v42, %v87_v41 }
  0xec   :  { %91 = vst.msk [vmem:[#allocation6] sm:$0x1] %vm90_vm2, %v89_v43 }
  0xed   :  { %142 = shalt.err (!%p139_p9)
}
  0xee   :  { %101 = dma.vmem_to_hbm [thread:$0]  %s99_s24, 16, %s192_s2, [#allocation4]  }
  0xef   :  { %153 = dma.done.wait [#allocation4], 16  }
  0xf0   :  { %154 = vsyncadd [#allocation4], 4294967280 }
  0xf1   :  { %105 = vsyncpa [#allocation4], 1 }
  0xf2   :  { %106 = vsyncpa [#allocation5], 1 }

</bundles_post_ra>
